<compile_context>
chip_gen: v7x
topology: tpu7x:2x2x1
jax: 0.10.0
libtpu: 0.0.40
codegen_flags: <defaults>
</compile_context>

<pallas_src>
import functools

import jax
import jax.numpy as jnp
from jax.experimental import pallas as pl
from jax.experimental.pallas import tpu as pltpu

LN_EPS = 1e-12  # config.layer_norm_eps


def _round_up(x, m):
    return (x + m - 1) // m * m


def _pick_batch_tile(B, max_bt=8):
    """Largest divisor of B <= max_bt that still leaves >= 2 grid steps."""
    candidates = [bt for bt in range(1, min(B, max_bt) + 1)
                  if B % bt == 0 and B // bt >= 2]
    return max(candidates) if candidates else 1


# ---------------------------------------------------------------------------
# Fused kernel (Bt batch rows per grid step):
#   out[:, :S]  = LN( text_x @ Wt + b_text      ) * gamma + beta
#   out[:, S:]  = LN( vis_x  @ Wv + b_vis_fused ) * gamma + beta
# LayerNorm statistics are single-pass in f32 over the REAL hidden size
# (padded lanes carry exact zeros and do not perturb the sums).
# ---------------------------------------------------------------------------
def _fused_embed_ln_kernel(xt_ref, xv_ref, wt_ref, wv_ref, p_ref, out_ref,
                           *, hidden_real, split_store, mxu_dtype):
    Bt, S, _ = xt_ref.shape
    _, V, _ = xv_ref.shape
    Hp = out_ref.shape[-1]
    b_text = p_ref[0:1, :]        # (1, Hp) f32, Linear bias (text)
    b_vis = p_ref[1:2, :]         # Linear bias + token-type row (visual)
    gamma = p_ref[2:3, :]
    beta = p_ref[3:4, :]
    inv_h = 1.0 / float(hidden_real)

    def project(x3, w):
        m = x3.shape[0] * x3.shape[1]
        # f32 -> bf16 in-vreg (inputs DMA'd as f32; no extra HBM cast pass).
        x = x3.reshape(m, x3.shape[2]).astype(mxu_dtype)
        return jnp.dot(x, w, preferred_element_type=jnp.float32)

    def layernorm(y):
        s1 = jnp.sum(y, axis=-1, keepdims=True)
        s2 = jnp.sum(y * y, axis=-1, keepdims=True)
        mu = s1 * inv_h
        # Clamp: single-pass variance can go slightly negative from
        # cancellation on bf16-matmul outputs.
        var = jnp.maximum(s2 * inv_h - mu * mu, 0.0)
        yhat = (y - mu) * jax.lax.rsqrt(var + LN_EPS)
        return (yhat * gamma + beta).astype(out_ref.dtype)

    text = layernorm(project(xt_ref[...], wt_ref[...]) + b_text)
    vis = layernorm(project(xv_ref[...], wv_ref[...]) + b_vis)
    text = text.reshape(Bt, S, Hp)
    vis = vis.reshape(Bt, V, Hp)

    if split_store:
        # Visual segment starts sublane-aligned: two dense unmasked stores.
        out_ref[:, pl.ds(0, S), :] = text
        out_ref[:, pl.ds(S, V), :] = vis
    else:
        # Misaligned start: concat in vregs and do ONE dense store instead of
        # a masked vst.msk + sublane-shift per row.
        out_ref[...] = jnp.concatenate([text, vis], axis=1)


def prepare_fused_params(Ww, bw, Wv, bv, tok_type_row, gamma, beta,
                         *, mxu_dtype=jnp.bfloat16):
    """Pad hidden axis to a lane-dense multiple of 128, cast weights to the
    MXU dtype, and pack the four per-feature vectors into one (4, Hp) block.
    Done once at module construction, not per forward call."""
    H = Ww.shape[1]
    Hp = _round_up(H, 128)
    pad = Hp - H

    def pad_h(a):
        return jnp.pad(a, ((0, 0), (0, pad))) if pad else a

    wt = pad_h(Ww).astype(mxu_dtype)
    wv = pad_h(Wv).astype(mxu_dtype)
    # Fold Linear bias + additive token-type embedding row into one vector.
    params = jnp.stack(
        [bw.astype(jnp.float32),
         (bv + tok_type_row).astype(jnp.float32),
         gamma.astype(jnp.float32),
         beta.astype(jnp.float32)], axis=0)          # (4, H)
    params = pad_h(params)
    return wt, wv, params, H, Hp


def fused_visual_embed_layernorm(text_x, vis_x, wt, wv, params, *,
                                 hidden_real,
                                 out_dtype=jnp.bfloat16,
                                 mxu_dtype=jnp.bfloat16,
                                 batch_tile=None):
    """Fused [text | visual] projection + bias/token-type add + LayerNorm.

    text_x: (B, S, Dw) f32,  vis_x: (B, V, Dv) f32
    wt: (Dw, Hp) mxu_dtype,  wv: (Dv, Hp) mxu_dtype
    params: (4, Hp) f32 = [b_text, b_vis_fused, gamma, beta]
    Returns (B, S+V, hidden_real) in out_dtype.
    """
    B, S, Dw = text_x.shape
    Bv, V, Dv = vis_x.shape
    assert B == Bv
    Hp = wt.shape[1]
    Stot = S + V

    Bt = batch_tile if batch_tile is not None else _pick_batch_tile(B)
    assert B % Bt == 0, (B, Bt)

    out_bytes = jnp.dtype(out_dtype).itemsize
    in_bytes = jnp.dtype(text_x.dtype).itemsize
    w_bytes = jnp.dtype(mxu_dtype).itemsize
    sub_align = 32 // out_bytes          # 8 rows (f32) / 16 rows (bf16)
    split_store = (S % sub_align == 0)

    # VMEM budget: double-buffered per-step blocks + resident weights/params
    # + headroom for f32 intermediates.  Always set explicitly (v5e default
    # is only 16 MiB); cap with headroom so it also fits v7x's 64 MiB VMEM.
    vmem_need = (2 * Bt * (S * Dw + V * Dv) * in_bytes
                 + 2 * Bt * Stot * Hp * out_bytes
                 + (Dw + Dv) * Hp * w_bytes
                 + 4 * Hp * 4
                 + 2 * Bt * Stot * Hp * 4
                 + (2 << 20))
    try:
        cap_bytes = int(pltpu.get_tpu_info().vmem_capacity_bytes)
    except Exception:
        cap_bytes = 64 << 20
    vmem_cap = min(cap_bytes * 3 // 4, 56 << 20)
    vmem_limit = int(min(max(vmem_need, 32 << 20), vmem_cap))

    out = pl.pallas_call(
        functools.partial(_fused_embed_ln_kernel, hidden_real=hidden_real,
                          split_store=split_store, mxu_dtype=mxu_dtype),
        out_shape=jax.ShapeDtypeStruct((B, Stot, Hp), out_dtype),
        grid_spec=pltpu.PrefetchScalarGridSpec(
            num_scalar_prefetch=0,
            grid=(B // Bt,),
            in_specs=[
                pl.BlockSpec((Bt, S, Dw), lambda b: (b, 0, 0)),   # text rows
                pl.BlockSpec((Bt, V, Dv), lambda b: (b, 0, 0)),   # visual rows
                pl.BlockSpec((Dw, Hp), lambda b: (0, 0)),         # W_text
                pl.BlockSpec((Dv, Hp), lambda b: (0, 0)),         # W_vis
                pl.BlockSpec((4, Hp), lambda b: (0, 0)),          # packed params
            ],
            out_specs=pl.BlockSpec((Bt, Stot, Hp), lambda b: (b, 0, 0)),
        ),
        compiler_params=pltpu.CompilerParams(
            dimension_semantics=("parallel",),
            vmem_limit_bytes=vmem_limit,
        ),
    )(text_x, vis_x, wt, wv, params)

    # Only taken when H is not a multiple of 128 (extra copy pass; moot for
    # production H=768).
    return out if Hp == hidden_real else out[..., :hidden_real]


# ---------------------------------------------------------------------------
# Module wrapper (parameter setup + glue in plain JAX)
# ---------------------------------------------------------------------------
class VisualT5EmbeddingsPallas:
    def __init__(self, key, *, hidden_size, word_embedding_dim,
                 visual_embedding_dim, max_position_embeddings,
                 type_vocab_size, out_dtype=jnp.bfloat16,
                 mxu_dtype=jnp.bfloat16):
        ks = jax.random.split(key, 6)
        std = 0.02
        H = hidden_size
        self.H = H
        self.out_dtype = out_dtype
        self.mxu_dtype = mxu_dtype

        self.position_emb = std * jax.random.normal(
            ks[0], (max_position_embeddings, H), jnp.float32)
        # special_visual_initialize=True -> clone of position_embeddings
        self.visual_position_emb = self.position_emb
        self.visual_token_type_emb = std * jax.random.normal(
            ks[1], (type_vocab_size, H), jnp.float32)
        # word_embedding_projection: Linear(word_embedding_dim -> H)
        self.Ww = std * jax.random.normal(
            ks[2], (word_embedding_dim, H), jnp.float32)
        self.bw = std * jax.random.normal(ks[3], (H,), jnp.float32)
        # visual_projection: Linear(visual_embedding_dim -> H)
        self.Wv = std * jax.random.normal(
            ks[4], (visual_embedding_dim, H), jnp.float32)
        self.bv = std * jax.random.normal(ks[5], (H,), jnp.float32)
        # LayerNorm
        self.gamma = jnp.ones((H,), jnp.float32)
        self.beta = jnp.zeros((H,), jnp.float32)

        # Pre-pad / pre-cast kernel-side parameters ONCE.
        # visual_token_type_ids default to all ones -> row 1 folded in here.
        (self._wt, self._wv, self._params, _, self._Hp) = prepare_fused_params(
            self.Ww, self.bw, self.Wv, self.bv,
            self.visual_token_type_emb[1], self.gamma, self.beta,
            mxu_dtype=mxu_dtype)

    def __call__(self, t5_inputs_embeds, visual_embeds, *,
                 materialize_positions=True):
        """
        t5_inputs_embeds: (B, S, word_embedding_dim) — output of the frozen T5
            encoder (`self.t5_model(input_ids, ...)`).
        visual_embeds:    (B, V, visual_embedding_dim)
        Returns (embeddings (B, S+V, H), position embeddings).  With
        materialize_positions=True (default) positions are broadcast to
        (B, S+V, H) to exactly match the original module's output shape; the
        compact (S+V, H) table is available with materialize_positions=False.
        """
        # TODO(synk): T5Encoder (frozen pretrained T5) has no clean Pallas
        # equivalent; the kernel consumes its output (`inputs_embeds`) directly.
        B, S, _ = t5_inputs_embeds.shape
        _, V, _ = visual_embeds.shape
        H = self.H

        embeddings = fused_visual_embed_layernorm(
            t5_inputs_embeds, visual_embeds, self._wt, self._wv, self._params,
            hidden_real=H, out_dtype=self.out_dtype, mxu_dtype=self.mxu_dtype)
        # dropout: eval mode => identity.
        # TODO(synk): training-mode dropout not implemented.

        # Final position embeddings: position_ids = arange(S) per row;
        # image_text_alignment is None => all visual positions use row 0.
        # TODO(synk): image_text_alignment != None branch (masked gather+mean)
        # not implemented.
        pos_table = jnp.concatenate(
            [self.position_emb[:S],
             jnp.broadcast_to(self.visual_position_emb[0][None], (V, H))],
            axis=0)                                             # (S+V, H)
        if materialize_positions:
            return embeddings, jnp.broadcast_to(pos_table[None], (B, S + V, H))
        return embeddings, pos_table


# ---------------------------------------------------------------------------
# Pure-JAX reference (mirrors the kernel's bf16 MXU operand precision)
# ---------------------------------------------------------------------------
def _reference(mod, t5_embeds, vis_embeds):
    f32 = jnp.float32
    B, S, _ = t5_embeds.shape
    _, V, _ = vis_embeds.shape
    H = mod.H

    def q(a):
        return a.astype(mod.mxu_dtype).astype(f32)

    text = q(t5_embeds) @ q(mod.Ww) + mod.bw
    vis = q(vis_embeds) @ q(mod.Wv) + mod.bv + mod.visual_token_type_emb[1]
    emb = jnp.concatenate([text, vis], axis=1)
    mu = jnp.mean(emb, axis=-1, keepdims=True)
    var = jnp.mean((emb - mu) ** 2, axis=-1, keepdims=True)
    emb = (emb - mu) * jax.lax.rsqrt(var + LN_EPS) * mod.gamma + mod.beta
    pos_table = jnp.concatenate(
        [mod.position_emb[:S],
         jnp.broadcast_to(mod.visual_position_emb[0][None], (V, H))], axis=0)
    pos = jnp.broadcast_to(pos_table[None], (B, S + V, H))
    return emb, pos


if __name__ == "__main__":
    key = jax.random.PRNGKey(0)
    k_param, k_t1, k_v1, k_t2, k_v2 = jax.random.split(key, 5)

    hidden_size = 32
    word_embedding_dim = 64
    visual_embedding_dim = 48
    max_position_embeddings = 16
    type_vocab_size = 2

    mod = VisualT5EmbeddingsPallas(
        k_param,
        hidden_size=hidden_size,
        word_embedding_dim=word_embedding_dim,
        visual_embedding_dim=visual_embedding_dim,
        max_position_embeddings=max_position_embeddings,
        type_vocab_size=type_vocab_size,
    )

    # Case 1: B=2, S=8, V=8 — exercises the single concatenated-store path
    # (S not a multiple of the bf16 sublane tile) and 2 parallel grid steps.
    B, S, V = 2, 8, 8
    t5_embeds = jax.random.normal(k_t1, (B, S, word_embedding_dim), jnp.float32)
    vis_embeds = jax.random.normal(k_v1, (B, V, visual_embedding_dim), jnp.float32)

    emb, pos = mod(t5_embeds, vis_embeds)
    jax.block_until_ready(emb)
    jax.block_until_ready(pos)

    emb_ref, pos_ref = _reference(mod, t5_embeds, vis_embeds)
    assert emb.shape == (B, S + V, hidden_size)
    assert emb.dtype == mod.out_dtype
    err = float(jnp.max(jnp.abs(emb.astype(jnp.float32) - emb_ref)))
    assert err < 4e-2, err
    assert pos.shape == (B, S + V, hidden_size)
    assert jnp.allclose(pos, pos_ref, atol=1e-6, rtol=1e-6)

    # Compact position table form.
    emb_c, pos_table = mod(t5_embeds, vis_embeds, materialize_positions=False)
    jax.block_until_ready(pos_table)
    assert pos_table.shape == (S + V, hidden_size)
    assert jnp.allclose(pos_table, pos_ref[0], atol=1e-6, rtol=1e-6)

    # Case 2: B=4, S=16, V=8 — aligned split-store path with Bt=2 batch tiling.
    B2, S2, V2 = 4, 16, 8
    t5_b = jax.random.normal(k_t2, (B2, S2, word_embedding_dim), jnp.float32)
    vis_b = jax.random.normal(k_v2, (B2, V2, visual_embedding_dim), jnp.float32)
    emb2, pos2 = mod(t5_b, vis_b)
    jax.block_until_ready(emb2)
    emb2_ref, pos2_ref = _reference(mod, t5_b, vis_b)
    err2 = float(jnp.max(jnp.abs(emb2.astype(jnp.float32) - emb2_ref)))
    assert emb2.shape == (B2, S2 + V2, hidden_size)
    assert err2 < 4e-2, err2
    assert jnp.allclose(pos2, pos2_ref, atol=1e-6, rtol=1e-6)

    print("KERNEL_OK")
</pallas_src>

<mosaic_0001>
module attributes {stable_mosaic.version = 11 : i64} {
  func.func @_fused_embed_ln_kernel(%arg0: i32, %arg1: memref<1x8x64xf32, #tpu.memory_space<vmem>>, %arg2: memref<1x8x48xf32, #tpu.memory_space<vmem>>, %arg3: memref<64x128xbf16, #tpu.memory_space<vmem>>, %arg4: memref<48x128xbf16, #tpu.memory_space<vmem>>, %arg5: memref<4x128xf32, #tpu.memory_space<vmem>>, %arg6: memref<1x16x128xbf16, #tpu.memory_space<vmem>>) attributes {dimension_semantics = [#tpu.dimension_semantics<parallel>], iteration_bounds = array<i64: 2>, scalar_prefetch = 0 : i64, scratch_operands = 0 : i64, tpu.core_type = #tpu.core_type<tc>, window_params = [{transform_indices = @transform_0, window_bounds = array<i64: 1, 8, 64>}, {transform_indices = @transform_1, window_bounds = array<i64: 1, 8, 48>}, {pipeline_mode = #tpu.pipeline_mode<synchronous>, transform_indices = @transform_2, window_bounds = array<i64: 64, 128>}, {pipeline_mode = #tpu.pipeline_mode<synchronous>, transform_indices = @transform_3, window_bounds = array<i64: 48, 128>}, {pipeline_mode = #tpu.pipeline_mode<synchronous>, transform_indices = @transform_4, window_bounds = array<i64: 4, 128>}, {transform_indices = @transform_5, window_bounds = array<i64: 1, 16, 128>}]} {
    %c0 = arith.constant 0 : index
    %c0_0 = arith.constant 0 : index
    %0 = vector.load %arg5[%c0, %c0_0] : memref<4x128xf32, #tpu.memory_space<vmem>>, vector<1x128xf32>
    %c1 = arith.constant 1 : index
    %c0_1 = arith.constant 0 : index
    %1 = vector.load %arg5[%c1, %c0_1] : memref<4x128xf32, #tpu.memory_space<vmem>>, vector<1x128xf32>
    %c2 = arith.constant 2 : index
    %c0_2 = arith.constant 0 : index
    %2 = vector.load %arg5[%c2, %c0_2] : memref<4x128xf32, #tpu.memory_space<vmem>>, vector<1x128xf32>
    %c3 = arith.constant 3 : index
    %c0_3 = arith.constant 0 : index
    %3 = vector.load %arg5[%c3, %c0_3] : memref<4x128xf32, #tpu.memory_space<vmem>>, vector<1x128xf32>
    %c0_4 = arith.constant 0 : index
    %c0_5 = arith.constant 0 : index
    %c0_6 = arith.constant 0 : index
    %4 = vector.load %arg1[%c0_4, %c0_5, %c0_6] : memref<1x8x64xf32, #tpu.memory_space<vmem>>, vector<1x8x64xf32>
    %c0_7 = arith.constant 0 : index
    %c0_8 = arith.constant 0 : index
    %5 = vector.load %arg3[%c0_7, %c0_8] : memref<64x128xbf16, #tpu.memory_space<vmem>>, vector<64x128xbf16>
    %6 = vector.shape_cast %4 : vector<1x8x64xf32> to vector<8x64xf32>
    %7 = arith.truncf %6 : vector<8x64xf32> to vector<8x64xbf16>
    %cst = arith.constant dense<0.000000e+00> : vector<8x128xf32>
    %8 = tpu.matmul %7, %5, %cst {dimension_numbers = #tpu.dot_dimension_numbers<[1], [0], [0], [1], [0, 0, 1, 1], [], []>} : vector<8x64xbf16>, vector<64x128xbf16>, vector<8x128xf32> -> vector<8x128xf32>
    %9 = vector.broadcast %0 : vector<1x128xf32> to vector<8x128xf32>
    %10 = arith.addf %8, %9 : vector<8x128xf32>
    %cst_9 = arith.constant dense<0.000000e+00> : vector<8xf32>
    %11 = vector.multi_reduction <add>, %10, %cst_9 [1] : vector<8x128xf32> to vector<8xf32>
    %12 = vector.shape_cast %11 : vector<8xf32> to vector<8x1xf32>
    %13 = arith.mulf %10, %10 : vector<8x128xf32>
    %cst_10 = arith.constant dense<0.000000e+00> : vector<8xf32>
    %14 = vector.multi_reduction <add>, %13, %cst_10 [1] : vector<8x128xf32> to vector<8xf32>
    %15 = vector.shape_cast %14 : vector<8xf32> to vector<8x1xf32>
    %cst_11 = arith.constant 3.125000e-02 : f32
    %16 = vector.broadcast %cst_11 : f32 to vector<8x1xf32>
    %17 = arith.mulf %12, %16 : vector<8x1xf32>
    %cst_12 = arith.constant 3.125000e-02 : f32
    %18 = vector.broadcast %cst_12 : f32 to vector<8x1xf32>
    %19 = arith.mulf %15, %18 : vector<8x1xf32>
    %20 = arith.mulf %17, %17 : vector<8x1xf32>
    %21 = arith.subf %19, %20 : vector<8x1xf32>
    %cst_13 = arith.constant 0.000000e+00 : f32
    %22 = vector.broadcast %cst_13 : f32 to vector<8x1xf32>
    %23 = arith.maximumf %21, %22 : vector<8x1xf32>
    %24 = vector.broadcast %17 : vector<8x1xf32> to vector<8x128xf32>
    %25 = arith.subf %10, %24 : vector<8x128xf32>
    %cst_14 = arith.constant 9.99999996E-13 : f32
    %26 = vector.broadcast %cst_14 : f32 to vector<8x1xf32>
    %27 = arith.addf %23, %26 : vector<8x1xf32>
    %28 = math.rsqrt %27 : vector<8x1xf32>
    %29 = vector.broadcast %28 : vector<8x1xf32> to vector<8x128xf32>
    %30 = arith.mulf %25, %29 : vector<8x128xf32>
    %31 = vector.broadcast %2 : vector<1x128xf32> to vector<8x128xf32>
    %32 = arith.mulf %30, %31 : vector<8x128xf32>
    %33 = vector.broadcast %3 : vector<1x128xf32> to vector<8x128xf32>
    %34 = arith.addf %32, %33 : vector<8x128xf32>
    %35 = arith.truncf %34 : vector<8x128xf32> to vector<8x128xbf16>
    %c0_15 = arith.constant 0 : index
    %c0_16 = arith.constant 0 : index
    %c0_17 = arith.constant 0 : index
    %36 = vector.load %arg2[%c0_15, %c0_16, %c0_17] : memref<1x8x48xf32, #tpu.memory_space<vmem>>, vector<1x8x48xf32>
    %c0_18 = arith.constant 0 : index
    %c0_19 = arith.constant 0 : index
    %37 = vector.load %arg4[%c0_18, %c0_19] : memref<48x128xbf16, #tpu.memory_space<vmem>>, vector<48x128xbf16>
    %38 = vector.shape_cast %36 : vector<1x8x48xf32> to vector<8x48xf32>
    %39 = arith.truncf %38 : vector<8x48xf32> to vector<8x48xbf16>
    %cst_20 = arith.constant dense<0.000000e+00> : vector<8x128xf32>
    %40 = tpu.matmul %39, %37, %cst_20 {dimension_numbers = #tpu.dot_dimension_numbers<[1], [0], [0], [1], [0, 0, 1, 1], [], []>} : vector<8x48xbf16>, vector<48x128xbf16>, vector<8x128xf32> -> vector<8x128xf32>
    %41 = vector.broadcast %1 : vector<1x128xf32> to vector<8x128xf32>
    %42 = arith.addf %40, %41 : vector<8x128xf32>
    %cst_21 = arith.constant dense<0.000000e+00> : vector<8xf32>
    %43 = vector.multi_reduction <add>, %42, %cst_21 [1] : vector<8x128xf32> to vector<8xf32>
    %44 = vector.shape_cast %43 : vector<8xf32> to vector<8x1xf32>
    %45 = arith.mulf %42, %42 : vector<8x128xf32>
    %cst_22 = arith.constant dense<0.000000e+00> : vector<8xf32>
    %46 = vector.multi_reduction <add>, %45, %cst_22 [1] : vector<8x128xf32> to vector<8xf32>
    %47 = vector.shape_cast %46 : vector<8xf32> to vector<8x1xf32>
    %cst_23 = arith.constant 3.125000e-02 : f32
    %48 = vector.broadcast %cst_23 : f32 to vector<8x1xf32>
    %49 = arith.mulf %44, %48 : vector<8x1xf32>
    %cst_24 = arith.constant 3.125000e-02 : f32
    %50 = vector.broadcast %cst_24 : f32 to vector<8x1xf32>
    %51 = arith.mulf %47, %50 : vector<8x1xf32>
    %52 = arith.mulf %49, %49 : vector<8x1xf32>
    %53 = arith.subf %51, %52 : vector<8x1xf32>
    %cst_25 = arith.constant 0.000000e+00 : f32
    %54 = vector.broadcast %cst_25 : f32 to vector<8x1xf32>
    %55 = arith.maximumf %53, %54 : vector<8x1xf32>
    %56 = vector.broadcast %49 : vector<8x1xf32> to vector<8x128xf32>
    %57 = arith.subf %42, %56 : vector<8x128xf32>
    %cst_26 = arith.constant 9.99999996E-13 : f32
    %58 = vector.broadcast %cst_26 : f32 to vector<8x1xf32>
    %59 = arith.addf %55, %58 : vector<8x1xf32>
    %60 = math.rsqrt %59 : vector<8x1xf32>
    %61 = vector.broadcast %60 : vector<8x1xf32> to vector<8x128xf32>
    %62 = arith.mulf %57, %61 : vector<8x128xf32>
    %63 = vector.broadcast %2 : vector<1x128xf32> to vector<8x128xf32>
    %64 = arith.mulf %62, %63 : vector<8x128xf32>
    %65 = vector.broadcast %3 : vector<1x128xf32> to vector<8x128xf32>
    %66 = arith.addf %64, %65 : vector<8x128xf32>
    %67 = arith.truncf %66 : vector<8x128xf32> to vector<8x128xbf16>
    %68 = vector.shape_cast %35 : vector<8x128xbf16> to vector<1x8x128xbf16>
    %69 = vector.shape_cast %67 : vector<8x128xbf16> to vector<1x8x128xbf16>
    %70 = tpu.concatenate %68, %69 in 1 : vector<1x8x128xbf16>, vector<1x8x128xbf16> -> vector<1x16x128xbf16>
    %c0_27 = arith.constant 0 : index
    %c0_28 = arith.constant 0 : index
    %c0_29 = arith.constant 0 : index
    %71 = vector.load %arg6[%c0_27, %c0_28, %c0_29] : memref<1x16x128xbf16, #tpu.memory_space<vmem>>, vector<1x16x128xbf16>
    tpu.vector_store %arg6[%c0_27, %c0_28, %c0_29], %70 {strides = array<i32>} : memref<1x16x128xbf16, #tpu.memory_space<vmem>>, vector<1x16x128xbf16>,
    return
  }
  func.func @transform_0(%arg0: i32) -> (i32, i32, i32) {
    %c0_i32 = arith.constant 0 : i32
    %c0_i32_0 = arith.constant 0 : i32
    %c0_i32_1 = arith.constant 0 : i32
    return %arg0, %c0_i32, %c0_i32_0 : i32, i32, i32
  }
  func.func @transform_1(%arg0: i32) -> (i32, i32, i32) {
    %c0_i32 = arith.constant 0 : i32
    %c0_i32_0 = arith.constant 0 : i32
    %c0_i32_1 = arith.constant 0 : i32
    return %arg0, %c0_i32, %c0_i32_0 : i32, i32, i32
  }
  func.func @transform_2(%arg0: i32) -> (i32, i32) {
    %c0_i32 = arith.constant 0 : i32
    %c0_i32_0 = arith.constant 0 : i32
    %c0_i32_1 = arith.constant 0 : i32
    return %c0_i32, %c0_i32_0 : i32, i32
  }
  func.func @transform_3(%arg0: i32) -> (i32, i32) {
    %c0_i32 = arith.constant 0 : i32
    %c0_i32_0 = arith.constant 0 : i32
    %c0_i32_1 = arith.constant 0 : i32
    return %c0_i32, %c0_i32_0 : i32, i32
  }
  func.func @transform_4(%arg0: i32) -> (i32, i32) {
    %c0_i32 = arith.constant 0 : i32
    %c0_i32_0 = arith.constant 0 : i32
    %c0_i32_1 = arith.constant 0 : i32
    return %c0_i32, %c0_i32_0 : i32, i32
  }
  func.func @transform_5(%arg0: i32) -> (i32, i32, i32) {
    %c0_i32 = arith.constant 0 : i32
    %c0_i32_0 = arith.constant 0 : i32
    %c0_i32_1 = arith.constant 0 : i32
    return %arg0, %c0_i32, %c0_i32_0 : i32, i32, i32
  }
}

</mosaic_0001>

<bundles_post_ra>
// kernel: tpu_custom_call.1
= control target key start
LH: loop header
LB: loop body
LE: loop exit
PB: predicated region body
PF: predicated region fallthrough
CT: control target
= control target key end

     0   :  { %s1336_s0 = inlined_call_operand.hbm [shape: f32[2,8,64], index: 0, kind: input, shape index: {}]   ;;  %s1337_s1 = inlined_call_operand.hbm [shape: f32[2,8,48], index: 1, kind: input, shape index: {}]   ;;  %s1338_s2 = inlined_call_operand.hbm [shape: bf16[64,128], index: 2, kind: input, shape index: {}]   ;;  %s1339_s3 = inlined_call_operand.hbm [shape: bf16[48,128], index: 3, kind: input, shape index: {}]   ;;  %s1340_s4 = inlined_call_operand.vmem [shape: f32[4,128], index: 4, kind: input, shape index: {}]   ;;  %s1341_s5 = inlined_call_operand.hbm [shape: bf16[2,16,128], index: 5, kind: output, shape index: {}]  }
   0x1   :  { %1346 = sst [smem:[#allocation16_spill]] %s1338_s2 }
   0x2   :  { %1347 = sst [smem:[#allocation17_spill]] %s1339_s3 }
   0x3   :  { %10 = vsyncpa [#allocation3], 0 }
   0x4   :  { %12 = vsyncpa [#allocation3 + $0x1], 0 }
   0x5   :  { %13 = vsyncpa [#allocation6], 0 }
   0x6   :  { %15 = vsyncpa [#allocation6 + $0x1], 0 }
   0x7   :  { %16 = vsyncpa [#allocation9], 0 }
   0x8   :  { %17 = vsyncpa [#allocation4], 0 }
   0x9   :  { %19 = vsyncpa [#allocation4 + $0x1], 0  ;;  %s1046_s18 = smov 0   ;;  %s1048_s19 = smov 0  }
   0xa   :  { %s1050_s20 = smov 0   ;;  %s1052_s21 = smov 0  }
   0xb LB: > { %s1067_s22 = sadd.s32 4294967295, %s1003_s21   ;;  %s653_s23 = sadd.s32 4294967294, %s1003_s21   ;;  %s1003_s21 = sphi %s1052_s21, %s1369_s21   ;;  %s999_s20 = sphi %s1050_s20, %s1368_s20   ;;  %s995_s19 = sphi %s1048_s19, %s1367_s19   ;;  %s991_s18 = sphi %s1046_s18, %s1366_s18  }
   0xc   : > { %p45_p0 = scmp.ne.s32.totalorder %s995_s19, %s991_s18  ;;  %p1342_p1 = scmp.eq.s32.totalorder %s1067_s22, 0 }
   0xd   : > { %p164_p3 = scmp.eq.s32.totalorder %s653_s23, 1  ;;  %p654_p5 = scmp.ge.s32.totalorder %s1003_s21, 1 }
   0xe   : > { %p1076_p4 = por %p1342_p1, %p45_p0  ;;  %p171_p7 = scmp.lt.s32.totalorder %s1003_s21, 3 }
   0xf   : > { %p1081_p6 = por %p164_p3, %p45_p0  ;;  %s1005_s27 = smov [#allocation7]  }
  0x10   : > { %s1348_s24 = scalar_select %p1076_p4, 1, 0 }
  0x11   : > { %s1349_s25 = scalar_select %p1081_p6, 1, 0 }
  0x12   : > { %p1086_p8 = pnand %p654_p5, %p171_p7  ;;  %s183_s28 = sshll.u32 %s1005_s27, 4  ;;  %s1090_s28 = int_to_ptr.vmem [resolvable:$true] %s183_s28 }
  0x13   : > { %s1006_s30 = smov [#allocation8]   ;;  %s1352_s2 = sld [smem:[#allocation16_spill]] }
  0x14   : > { %s1350_s26 = scalar_select %p1086_p8, 1, 0 }
  0x15   : > { %p734_p9 = pneg %p1086_p8  ;;  %s196_s6 = sshll.u32 %s1006_s30, 4  ;;  %s1101_s6 = int_to_ptr.vmem [resolvable:$true] %s196_s6 }
  0x17   : > { %p1097_p11 = pnand %p734_p9, %p1342_p1 }
  0x19   : > { %s809_s9 = scalar_lea.hbm %s1352_s2, 512  ;;  %p811_p13 = pneg %p1097_p11 }
  0x1a   : > { %p810_p12 = scmp.ne.s32.totalorder %s1352_s2, %s809_s9  ;;  %p816_p5 = scmp.lt.u32.totalorder %s809_s9, %s1352_s2 }
  0x1c   : > { %p812_p0 = pnand %p811_p13, %p810_p12 }
  0x1e   : > { %p813_p3 = pneg %p812_p0 }
  0x20   : > { %p818_p7 = pnand %p816_p5, %p813_p3 }
  0x22   : > { %821 = shalt.err (!%p818_p7)
}
  0x23   : > { %s822_s14 = scalar_lea.vmem %s1090_s28, 512  ;;  %p830_p2 = scmp.lt.s32.totalorder %s1090_s28, %s1090_s28 }
  0x24   : > { %p823_p9 = scmp.ne.s32.totalorder %s1090_s28, %s822_s14  ;;  %p831_p12 = scmp.lt.s32.totalorder %s822_s14, %s822_s14 }
  0x26   : > { %p825_p10 = pnand %p823_p9, %p811_p13  ;;  %p832_p0 = por %p831_p12, %p830_p2 }
  0x28   : > { %p826_p1 = pneg %p825_p10 }
  0x2a   : > { %p833_p6 = pnand %p832_p0, %p826_p1 }
  0x2c   : > { %836 = shalt.err (!%p833_p6)
}
  0x2d   : > { %s1007_s15 = smov 64   ;;  %s1008_s16 = smov 4  }
  0x2e   : > { %737 = dma.hbm_to_vmem [thread:$0]  (!%p1097_p11), %s1352_s2, 512, %s1090_s28, [#allocation6], %s1007_s15, %s1007_s15, %s1008_s16  }
  0x2f   : > { %s1353_s3 = sld [smem:[#allocation17_spill]] }
  0x35   : > { %s837_s7 = scalar_lea.hbm %s1353_s3, 384 }
  0x36   : > { %p838_p2 = scmp.ne.s32.totalorder %s1353_s3, %s837_s7  ;;  %p844_p10 = scmp.lt.u32.totalorder %s837_s7, %s1353_s3 }
  0x38   : > { %p840_p1 = pnand %p838_p2, %p811_p13 }
  0x3a   : > { %p841_p6 = pneg %p840_p1 }
  0x3c   : > { %p846_p3 = pnand %p844_p10, %p841_p6 }
  0x3e   : > { %849 = shalt.err (!%p846_p3)
}
  0x3f   : > { %s850_s28 = scalar_lea.vmem %s1101_s6, 384  ;;  %p858_p12 = scmp.lt.s32.totalorder %s1101_s6, %s1101_s6 }
  0x40   : > { %p851_p5 = scmp.ne.s32.totalorder %s1101_s6, %s850_s28  ;;  %p859_p0 = scmp.lt.s32.totalorder %s850_s28, %s850_s28 }
  0x42   : > { %p853_p7 = pnand %p851_p5, %p811_p13  ;;  %p860_p2 = por %p859_p0, %p858_p12 }
  0x44   : > { %p854_p9 = pneg %p853_p7 }
  0x46   : > { %p861_p1 = pnand %p860_p2, %p854_p9 }
  0x48   : > { %864 = shalt.err (!%p861_p1)
}
  0x49   : > { %740 = dma.hbm_to_vmem [thread:$0]  (!%p1097_p11), %s1353_s3, 384, %s1101_s6, [#allocation9], %s1007_s15, %s1007_s15, %s1008_s16  }
  0x4a   : > { %s1156_s14 = sadd.s32 1, %s1003_s21   ;;  %s32_s29 = sadd.s32 1, %s999_s20 }
  0x4b   : > { %s29_s17 = ssub.s32 %s1003_s21, %s1156_s14  ;;  %p39_p13 = scmp.ne.s32.totalorder %s999_s20, %s995_s19 }
  0x4c   : > { %p30_p6 = scmp.eq.s32.totalorder %s29_s17, 0  ;;  %p40_p10 = scmp.eq.s32.totalorder %s1003_s21, 0 }
  0x4d   : > { %p1354_p3 = scmp.eq.s32.totalorder %s1067_s22, 1  ;;  %p754_p7 = scmp.lt.s32.totalorder %s1003_s21, 2 }
  0x4e   : > { %s1172_s27 = scalar_select %p30_p6, %s999_s20, %s32_s29  }
  0x4f   : > { %p1166_p5 = por %p1354_p3, %p39_p13  ;;  %p41_p9 = por %p40_p10, %p39_p13 }
  0x50   : > { %s213_s30 = sand.u32 1, %s999_s20   ;;  %s659_s15 = sshll.u32 %s1003_s21, 7 }
  0x51   : > { %s1355_s23 = scalar_select %p1166_p5, 1, 0 }
  0x52   : > { %s1175_s6 = sshll.u32 %s213_s30, 3  ;;  %s1181_s8 = scalar_lea.hbm %s1336_s0, %s659_s15 }
  0x53   : > { %s217_s9 = scalar_lea.vmem [#allocation2], %s1175_s6  ;;  %p1186_p11 = pnand %p754_p7, %p41_p9 }
  0x54   : > { %s224_s10 = sshll.u32 %s217_s9, 4  ;;  %s1193_s13 = scalar_lea.hbm %s1337_s1, %s659_s15  ;;  %s1184_s10 = int_to_ptr.vmem [resolvable:$true] %s224_s10 }
  0x55   : > { %s231_s29 = sand.u32 1, %s1003_s21   ;;  %s214_s17 = scalar_lea.sflag [#allocation3], %s213_s30 }
  0x56   : > { %s865_s16 = scalar_lea.hbm %s1181_s8, 128  ;;  %p867_p0 = pneg %p1186_p11 }
  0x57   : > { %p866_p12 = scmp.ne.s32.totalorder %s1181_s8, %s865_s16  ;;  %s870_s2 = scalar_lea.hbm %s1336_s0, 256 }
  0x58   : > { %p871_p13 = scmp.lt.u32.totalorder %s1181_s8, %s1336_s0  ;;  %p872_p6 = scmp.lt.u32.totalorder %s870_s2, %s865_s16 }
  0x59   : > { %p868_p2 = pnand %p867_p0, %p866_p12  ;;  %p874_p3 = scmp.lt.u32.totalorder %s865_s16, %s1181_s8 }
  0x5a   : > { %p873_p10 = por %p872_p6, %p871_p13 }
  0x5b   : > { %p869_p1 = pneg %p868_p2 }
  0x5c   : > { %p875_p7 = por %p874_p3, %p873_p10 }
  0x5e   : > { %p876_p9 = pnand %p875_p7, %p869_p1 }
  0x60   : > { %879 = shalt.err (!%p876_p9)
}
  0x61   : > { %s880_s30 = scalar_lea.vmem %s1184_s10, 128  ;;  %s1009_s15 = smov [#allocation2]  }
  0x62   : > { %p881_p12 = scmp.ne.s32.totalorder %s1184_s10, %s880_s30  ;;  %s885_s12 = sshll.u32 %s1009_s15, 4  ;;  %s886_s12 = int_to_ptr.vmem [resolvable:$false] %s885_s12 }
  0x63   : > { %s887_s3 = scalar_lea.vmem %s886_s12, 256  ;;  %p888_p4 = scmp.lt.s32.totalorder %s1184_s10, %s886_s12 }
  0x64   : > { %p883_p2 = pnand %p881_p12, %p867_p0  ;;  %p889_p13 = scmp.lt.s32.totalorder %s887_s3, %s880_s30 }
  0x66   : > { %p884_p5 = pneg %p883_p2  ;;  %p890_p6 = por %p889_p13, %p888_p4 }
  0x68   : > { %p891_p10 = pnand %p890_p6, %p884_p5 }
  0x6a   : > { %894 = shalt.err (!%p891_p10)
}
  0x6b   : > { %744 = dma.hbm_to_vmem [thread:$0]  (!%p1186_p11), %s1181_s8, 128, %s1184_s10, %s214_s17  }
  0x6c   : > { %s235_s2 = scalar_lea.vmem [#allocation5], %s1175_s6  ;;  %s232_s7 = scalar_lea.sflag [#allocation6], %s231_s29 }
  0x6d   : > { %s242_s16 = sshll.u32 %s235_s2, 4  ;;  %s895_s9 = scalar_lea.hbm %s1193_s13, 128  ;;  %s243_s16 = int_to_ptr.vmem [resolvable:$true] %s242_s16 }
  0x6e   : > { %p896_p4 = scmp.ne.s32.totalorder %s1193_s13, %s895_s9  ;;  %s900_s15 = scalar_lea.hbm %s1337_s1, 256 }
  0x6f   : > { %p901_p3 = scmp.lt.u32.totalorder %s1193_s13, %s1337_s1  ;;  %p902_p7 = scmp.lt.u32.totalorder %s900_s15, %s895_s9 }
  0x70   : > { %p898_p5 = pnand %p896_p4, %p867_p0  ;;  %p904_p12 = scmp.lt.u32.totalorder %s895_s9, %s1193_s13 }
  0x71   : > { %p903_p9 = por %p902_p7, %p901_p3 }
  0x72   : > { %p899_p1 = pneg %p898_p5 }
  0x73   : > { %p905_p2 = por %p904_p12, %p903_p9 }
  0x75   : > { %p906_p13 = pnand %p905_p2, %p899_p1 }
  0x77   : > { %909 = shalt.err (!%p906_p13)
}
  0x78   : > { %s910_s6 = scalar_lea.vmem %s243_s16, 128  ;;  %s1010_s8 = smov [#allocation5]  }
  0x79   : > { %p911_p6 = scmp.ne.s32.totalorder %s243_s16, %s910_s6  ;;  %s915_s10 = sshll.u32 %s1010_s8, 4  ;;  %s916_s10 = int_to_ptr.vmem [resolvable:$false] %s915_s10 }
  0x7a   : > { %s917_s29 = scalar_lea.vmem %s916_s10, 256  ;;  %p918_p5 = scmp.lt.s32.totalorder %s243_s16, %s916_s10 }
  0x7b   : > { %p913_p10 = pnand %p911_p6, %p867_p0  ;;  %p919_p8 = scmp.lt.s32.totalorder %s917_s29, %s910_s6 }
  0x7d   : > { %p914_p4 = pneg %p913_p10  ;;  %p920_p3 = por %p919_p8, %p918_p5 }
  0x7f   : > { %p921_p7 = pnand %p920_p3, %p914_p4 }
  0x81   : > { %924 = shalt.err (!%p921_p7)
}
  0x82   : > { %747 = dma.hbm_to_vmem [thread:$0]  (!%p1186_p11), %s1193_s13, 128, %s243_s16, %s232_s7  }
  0x83   : > { %p1357_p1 = scmp.ne.s32.totalorder %s1350_s26, 0 }
  0x84   : > { %s1246_s17 = sand.u32 (!%p1357_p1), 1, %s995_s19   ;;  %p1358_p8 = scmp.ne.s32.totalorder (!%p1357_p1), %s1348_s24, 0 }
  0x85   : > { %251 = sbr.rel (%p1357_p1) target bundleno = 572 (0x23c), region = 40  ;;  %s1249_s2 = sshll.u32 (!%p1357_p1), %s1246_s17, 3 }
  0x86   : > { %s254_s9 = scalar_lea.sflag (!%p1357_p1), [#allocation3], %s1246_s17  ;;  %s257_s28 = scalar_lea.vmem (!%p1357_p1), [#allocation2], %s1249_s2 }
  0x8c   : > { %970 = dma.done.wait (%p1358_p8), %s254_s9, 128  }
  0x8d   : > { %972 = vsyncadd (%p1358_p8), %s254_s9, 4294967168  ;;  %s262_s26 = sand.u32 1, %s1067_s22   ;;  %s266_s13 = scalar_lea.vmem [#allocation5], %s1249_s2 }
  0x8e   : > { %s263_s11 = scalar_lea.sflag [#allocation6], %s262_s26 }
  0x8f   : > { %974 = dma.done.wait (%p1358_p8), %s263_s11, 128  }
  0x90   : > { %976 = vsyncadd (%p1358_p8), %s263_s11, 4294967168  ;;  %p1359_p11 = scmp.eq.s32.totalorder %s1067_s22, 0 }
  0x92   : > { %978 = dma.done.wait (%p1359_p11), [#allocation6], 512   ;;  %p1360_p0 = pmov %p1359_p11 }
  0x94   : > { %980 = vsyncadd (%p1360_p0), [#allocation6], 4294966784  ;;  %p1361_p9 = pmov %p1360_p0 }
  0x95   : > { %p1362_p12 = pmov %p1360_p0 }
  0x96   : > { %982 = dma.done.wait (%p1361_p9), [#allocation9], 384  }
  0x97   : > { %984 = vsyncadd (%p1362_p12), [#allocation9], 4294966912  ;;  %v1011_v0 = vmov 0.0   ;;  %vm1012_vm0 = vmmov 0   ;;  %v798_v1 = vld [vmem:[#allocation7] sm:$0xff]   ;;  %v800_v3 = vld [vmem:[#allocation7 + $0x8] sm:$0xff]  }
  0x98   : > { %698 = vmatprep.subr.bf16.mxu0 %v1011_v0  ;;  %710 = vmatprep.subr.bf16.mxu1 %v1011_v0  ;;  %v799_v2 = vld [vmem:[#allocation8] sm:$0xff]   ;;  %v801_v4 = vld [vmem:[#allocation8 + $0x8] sm:$0xff]   ;;  %v802_v5 = vld [vmem:[#allocation7 + $0x10] sm:$0xff]   ;;  %vm448_vm1 = vcmask 392192   ;;  %vm349_vm2 = vcmask 523264   ;;  %vm511_vm3 = vcmask 1043456  }
  0x99   : > { %716 = vmatprep.mubr.msk.bf16.mxu1 %vm1012_vm0, %v1011_v0  ;;  %706 = vmatprep.mubr.msk.bf16.mxu0 %vm1012_vm0, %v1011_v0  ;;  %v803_v6 = vld [vmem:[#allocation8 + $0x10] sm:$0xff]   ;;  %v804_v9 = vld [vmem:[#allocation7 + $0x18] sm:$0xff]   ;;  %v311_v10 = vld [vmem:[%s257_s28] sm:$0xff]  ;;  %s688_s8 = sshll.u32 %s1067_s22, 7  ;;  %s305_s10 = scalar_lea.vmem [#allocation10], %s1249_s2 }
  0x9a   : > { %699 = vmatpush3.bf16.msra.mxu0 %v798_v1  ;;  %711 = vmatpush3.bf16.msra.mxu1 %v799_v2  ;;  %v418_v7 = vld [vmem:[%s266_s13] sm:$0xff]  ;;  %v320_v11 = vpack.c.bf16 %v311_v10, %v311_v10  ;;  %v676_v12 = vld [vmem:[%s1340_s4 + $0x1] ss:$0 sm:$0xff]  ;;  %v668_v16 = vld [vmem:[%s1340_s4] ss:$0 sm:$0xff]  ;;  %s538_s29 = sshll.u32 %s305_s10, 4  ;;  %s1290_s26 = scalar_lea.hbm %s1341_s5, %s688_s8  ;;  %s1292_s29 = int_to_ptr.vmem [resolvable:$true] %s538_s29 }
  0x9b   : > { %700 = vmatprep.subr.bf16.mxu0 %v1011_v0  ;;  %712 = vmatprep.subr.bf16.mxu1 %v1011_v0  ;;  %v425_v8 = vpack.c.bf16 %v418_v7, %v418_v7  ;;  %v674_v44 = vld [vmem:[%s1340_s4 + $0x2] ss:$0 sm:$0xff]  ;;  %v675_v46 = vld [vmem:[%s1340_s4 + $0x3] ss:$0 sm:$0xff]  ;;  %s525_s22 = scalar_lea.sflag [#allocation4], %s1246_s17  ;;  %s925_s2 = scalar_lea.vmem %s1292_s29, 128 }
  0x9c   : > { %p926_p2 = scmp.ne.s32.totalorder %s1292_s29, %s925_s2  ;;  %p1363_p13 = scmp.ne.s32.totalorder %s1355_s23, 0 }
  0x9d   : > { %s1013_s11 = smov [#allocation10]  }
  0x9e   : > { %701 = vmatpush3.bf16.msra.mxu0 %v800_v3  ;;  %713 = vmatpush3.bf16.msra.mxu1 %v801_v4  ;;  %p927_p6 = pnand %p926_p2, %p1363_p13  ;;  %s929_s13 = sshll.u32 %s1013_s11, 4  ;;  %s930_s13 = int_to_ptr.vmem [resolvable:$false] %s929_s13 }
  0x9f   : > { %702 = vmatprep.subr.bf16.mxu0 %v1011_v0  ;;  %714 = vmatprep.subr.bf16.mxu1 %v1011_v0  ;;  %s931_s24 = scalar_lea.vmem %s930_s13, 256  ;;  %p932_p4 = scmp.lt.s32.totalorder %s1292_s29, %s930_s13 }
  0xa0   : > { %p928_p10 = pneg %p927_p6  ;;  %p933_p5 = scmp.lt.s32.totalorder %s931_s24, %s925_s2 }
  0xa2   : > { %703 = vmatpush3.bf16.msra.mxu0 %v802_v5  ;;  %715 = vmatpush3.bf16.msra.mxu1 %v803_v6  ;;  %p934_p3 = por %p933_p5, %p932_p4 }
  0xa3   : > { %704 = vmatprep.subr.bf16.mxu0 %v1011_v0 }
  0xa4   : > { %p935_p7 = pnand %p934_p3, %p928_p10 }
  0xa5   : > { %717 = vmatmul.mubr.msk.bf16.vlgmr.msra.gmra.mrb[0].mxu1 %vm448_vm1, %v425_v8 }
  0xa6   : > { %705 = vmatpush3.bf16.msra.mxu0 %v804_v9 }
  0xa9   : > { %707 = vmatmul.mubr.msk.bf16.vlgmr.msra.gmra.mrb[0].mxu0 %vm349_vm2, %v320_v11 }
 0x178   : > { %v486_v13 = vpop.f32.mrb[0].mxu1 }
 0x179   : > { %v487_v14 = vadd.f32 %v676_v12, %v486_v13  ;;  %v718_v15 = vpop.f32.mrb[1].mxu1 }
 0x17a   : > { %v489_v17 = vpop.f32.mrb[2].mxu1 }
 0x17b   : > { %v719_v18 = vpop.f32.mrb[3].mxu1  ;;  %492 = vadd.xlane.f32.xlu0 %v487_v14  ;;  %v494_v20 = vmul.f32 %v487_v14, %v487_v14 }
 0x17c   : > { %v387_v19 = vpop.f32.mrb[0].mxu0 }
 0x17d   : > { %v388_v21 = vadd.f32 %v668_v16, %v387_v19  ;;  %v708_v22 = vpop.f32.mrb[1].mxu0  ;;  %495 = vadd.xlane.f32.xlu1 %v494_v20 }
 0x17e   : > { %v390_v23 = vpop.f32.mrb[2].mxu0 }
 0x17f   : > { %v709_v24 = vpop.f32.mrb[3].mxu0  ;;  %v395_v25 = vmul.f32 %v388_v21, %v388_v21  ;;  %393 = vadd.xlane.f32.xlu0 %v388_v21 }
 0x181   : > { %396 = vadd.xlane.f32.xlu1 %v395_v25 }
 0x208   : > { %v493_v26 = vpop.xlane.xlu0 %492 }
 0x209   : > { %v497_v27 = vmul.f32 0.03125, %v493_v26 }
 0x20a   : > { %v496_v28 = vpop.xlane.xlu1 %495 }
 0x20b   : > { %v499_v29 = vmul.f32 %v497_v27, %v497_v27  ;;  %v498_v30 = vmul.f32 0.03125, %v496_v28  ;;  %v502_v42 = vsub.f32 %v487_v14, %v497_v27 }
 0x20c   : > { %v394_v31 = vpop.xlane.xlu0 %393 }
 0x20d   : > { %v500_v32 = vsub.f32 %v498_v30, %v499_v29  ;;  %v398_v33 = vmul.f32 0.03125, %v394_v31 }
 0x20e   : > { %v397_v34 = vpop.xlane.xlu1 %396 }
 0x20f   : > { %v501_v35 = vmax.f32 %v500_v32, 0.0  ;;  %v400_v36 = vmul.f32 %v398_v33, %v398_v33  ;;  %v399_v37 = vmul.f32 0.03125, %v397_v34  ;;  %v403_v48 = vsub.f32 %v388_v21, %v398_v33 }
 0x211   : > { %v503_v38 = vadd.f32 1e-12, %v501_v35  ;;  %v401_v39 = vsub.f32 %v399_v37, %v400_v36 }
 0x213   : > { %805 = vrsqrt.f32 %v503_v38  ;;  %v402_v40 = vmax.f32 %v401_v39, 0.0 }
 0x215   : > { %v404_v41 = vadd.f32 1e-12, %v402_v40 }
 0x217   : > { %807 = vrsqrt.f32 %v404_v41 }
 0x21d   : > { %v806_v43 = vpop.eup %805 }
 0x21e   : > { %v505_v45 = vmul.f32 %v806_v43, %v502_v42 }
 0x220   : > { %v506_v47 = vmul.f32 %v674_v44, %v505_v45 }
 0x221   : > { %v808_v49 = vpop.eup %807 }
 0x222   : > { %v507_v50 = vadd.f32 %v675_v46, %v506_v47  ;;  %v406_v51 = vmul.f32 %v808_v49, %v403_v48 }
 0x224   : > { %v508_v52 = vpack.c.bf16 %v507_v50, %v507_v50  ;;  %v411_v53 = vmul.f32 %v674_v44, %v406_v51 }
 0x226   : > { %v416_v54 = vadd.f32 %v675_v46, %v411_v53  ;;  %v510_v55 = vrot.slane %v508_v52, 4 }
 0x228   : > { %v417_v56 = vpack.c.bf16 %v416_v54, %v416_v54 }
 0x22a   : > { %v514_v57 = vsel %vm511_vm3, %v417_v56, %v510_v55 }
 0x22b   : > { %v681_v58 = vcombine.low %v514_v57, %v514_v57  ;;  %v682_v59 = vcombine.high %v514_v57, %v514_v57 }
 0x22d   : > { %522 = vst [vmem:[%s305_s10] sm:$0xf] %v681_v58  ;;  %523 = vst [vmem:[%s305_s10 + $0x4] sm:$0xf] %v682_v59 }
 0x22e   : > { %938 = shalt.err (!%p935_p7)
}
 0x22f   : > { %s939_s16 = scalar_lea.hbm %s1290_s26, 128  ;;  %s943_s15 = scalar_lea.hbm %s1341_s5, 256 }
 0x230   : > { %p940_p1 = scmp.ne.s32.totalorder %s1290_s26, %s939_s16  ;;  %p944_p0 = scmp.lt.u32.totalorder %s1290_s26, %s1341_s5 }
 0x231   : > { %p945_p9 = scmp.lt.u32.totalorder %s943_s15, %s939_s16  ;;  %p947_p2 = scmp.lt.u32.totalorder %s939_s16, %s1290_s26 }
 0x232   : > { %p941_p8 = pnand %p940_p1, %p1363_p13 }
 0x233   : > { %p946_p12 = por %p945_p9, %p944_p0 }
 0x234   : > { %p942_p11 = pneg %p941_p8 }
 0x235   : > { %p948_p6 = por %p947_p2, %p946_p12 }
 0x237   : > { %p949_p10 = pnand %p948_p6, %p942_p11 }
 0x239   : > { %952 = shalt.err (!%p949_p10)
}
 0x23a   : > { %s1014_s6 = smov 64   ;;  %s1015_s8 = smov 4  }
 0x23b   : > { %732 = dma.vmem_to_hbm [thread:$0]  (%p1363_p13), %s1292_s29, 128, %s1290_s26, %s525_s22, %s1014_s6, %s1014_s6, %s1015_s8  }
 0x23c PF: > { %s553_s10 = sand.u32 1, %s991_s18   ;;  %p1364_p4 = scmp.ne.s32.totalorder %s1349_s25, 0 }
 0x23d   : > { %p1365_p5 = scmp.ge.s32.totalorder %s1003_s21, 2  ;;  %s554_s9 = scalar_lea.sflag [#allocation4], %s553_s10 }
 0x23f   : > { %p749_p3 = pnand %p1365_p5, %p1364_p4 }
 0x241   : > { %986 = dma.done.wait (!%p749_p3), %s554_s9, 128  }
 0x242   : > { %988 = vsyncadd (!%p749_p3), %s554_s9, 4294967168  ;;  %p22_p7 = scmp.ge.s32.totalorder %s1156_s14, 4   ;;  %s1366_s18 = smov %s995_s19 }
 0x243   : > { %s1367_s19 = smov %s999_s20  ;;  %s1368_s20 = smov %s1172_s27 }
 0x244   : > { %s1369_s21 = smov %s1156_s14  ;;  %24 = sbr.rel (!%p22_p7) target bundleno = 11 (0xb), region = 106 }
 0x24b   :  { %559 = vsyncpa [#allocation3], 1 }
 0x24c   :  { %561 = vsyncpa [#allocation3 + $0x1], 1 }
 0x24d   :  { %562 = vsyncpa [#allocation6], 1 }
 0x24e   :  { %564 = vsyncpa [#allocation6 + $0x1], 1 }
 0x24f   :  { %565 = vsyncpa [#allocation9], 1 }
 0x250   :  { %566 = vsyncpa [#allocation4], 1 }
 0x251   :  { %568 = vsyncpa [#allocation4 + $0x1], 1 }

</bundles_post_ra>
